<compile_context>
chip_gen: v6e
topology: v6e:2x2x1
jax: 0.10.0
libtpu: 0.0.40
codegen_flags: <defaults>
</compile_context>

<pallas_src>
import math
import numpy as np
import jax
import jax.numpy as jnp
from jax.experimental import pallas as pl
from jax.experimental.pallas import tpu as pltpu


def tokenizer_kernel(x_num_ref, x_cat_ref, w_proj_ref, emb_proj_ref, bias_ref, out_ref):
    # x_num_ref   : (tb, d_num)            f32
    # x_cat_ref   : (tb, n_cat)            i32, category offsets already folded in
    # w_proj_ref  : (d_num, n_tok*d_tok)   f32, block-diagonal numerical projection
    # emb_proj_ref: (n_emb, n_tok*d_tok)   f32, each embedding row placed in its token's column block
    # bias_ref    : (1, n_tok*d_tok)       f32
    # out_ref     : (tb, n_tok*d_tok)      f32 lane-dense; wrapper reshapes to (B, n_tok, d_tok)
    tb = x_num_ref.shape[0]
    n_cat = x_cat_ref.shape[1]
    n_emb = emb_proj_ref.shape[0]

    # ---- numerical tokens: one MXU matmul against the block-diagonal projection,
    #      == (x_num[:, :, None] * weight).reshape(tb, d_num * d_tok) (zero-padded to n_tok*d_tok)
    acc = jnp.dot(x_num_ref[...], w_proj_ref[...],
                  preferred_element_type=jnp.float32)              # (tb, n_tok*d_tok)

    # ---- categorical tokens: combined one-hot gather as a single MXU matmul.
    # Offsetted ids of different categories live in disjoint ranges, so one
    # combined one-hot row per sample (n_cat ones) against the block-structured
    # table produces all n_cat embeddings at once, each in its own d_tok block.
    idx = x_cat_ref[...]                                           # (tb, n_cat) int32
    iota = jax.lax.broadcasted_iota(jnp.int32, (tb, n_emb), 1)
    onehot = (idx[:, 0:1] == iota).astype(jnp.float32)             # (tb, n_emb)
    for c in range(1, n_cat):                                      # tiny static loop, VALU adds only
        onehot = onehot + (idx[:, c:c + 1] == iota).astype(jnp.float32)
    acc = acc + jnp.dot(onehot, emb_proj_ref[...],
                        preferred_element_type=jnp.float32)        # (tb, n_tok*d_tok)

    # ---- bias added once, single lane-dense whole-block store ----
    out_ref[...] = acc + bias_ref[...]


def _build_projections(weight, emb, bias, categories):
    """Re-layout the parameters so the tokenizer becomes two matmuls into a
    flat lane-dense (n_tok*d_tok) output.  Exact: only 0/1 placement masks.
    (In real use these would be precomputed once per set of parameters.)"""
    d_num, d_tok = weight.shape
    n_cat = len(categories)
    n_emb = emb.shape[0]
    n_tok = d_num + n_cat

    # numerical feature f -> token f:  w_proj[f, f*d_tok + j] = weight[f, j], else 0
    num_sel = jnp.asarray(np.eye(d_num, n_tok, dtype=np.float32))            # (d_num, n_tok)
    w_proj = (num_sel[:, :, None] * weight[:, None, :]).reshape(d_num, n_tok * d_tok)

    # embedding row e (global, offsetted id) -> token d_num + category(e)
    cat_of = np.repeat(np.arange(n_cat), np.asarray(categories))             # (n_emb,)
    row_sel = np.zeros((n_emb, n_tok), dtype=np.float32)
    row_sel[np.arange(n_emb), d_num + cat_of] = 1.0
    emb_proj = (jnp.asarray(row_sel)[:, :, None] * emb[:, None, :]).reshape(n_emb, n_tok * d_tok)

    bias_flat = bias.reshape(1, n_tok * d_tok)
    return w_proj, emb_proj, bias_flat


def _default_batch_tile(B):
    """Large tiles amortize the ~0.35us per-grid-step overhead; keep >= 2 grid
    steps so both v7x TensorCores get work; prefer sublane-friendly multiples of 8."""
    if B < 16:
        return B
    target = min(512, B // 2)
    for t in range(target, 0, -1):
        if B % t == 0 and t % 8 == 0:
            return t
    for t in range(target, 0, -1):
        if B % t == 0:
            return t
    return B


def tokenizer_forward(x_num, x_cat, offsets, weight, emb, bias, categories, *, tb=None):
    """Pallas Tokenizer forward.  Returns (B, n_tokens, d_token) float32."""
    B, d_num = x_num.shape
    n_cat = x_cat.shape[1]
    n_emb, d_tok = emb.shape
    n_tok = d_num + n_cat
    if tb is None:
        tb = _default_batch_tile(B)
    assert B % tb == 0

    # Wrapper-side parameter re-layout (tiny, exact) + fold offsets into the ids.
    w_proj, emb_proj, bias_flat = _build_projections(weight, emb, bias, categories)
    x_cat_idx = x_cat.astype(jnp.int32) + offsets.reshape(1, n_cat).astype(jnp.int32)

    out_flat = pl.pallas_call(
        tokenizer_kernel,
        out_shape=jax.ShapeDtypeStruct((B, n_tok * d_tok), jnp.float32),
        grid_spec=pltpu.PrefetchScalarGridSpec(
            num_scalar_prefetch=0,
            grid=(B // tb,),
            in_specs=[
                pl.BlockSpec((tb, d_num), lambda i: (i, 0)),                 # x_num tile
                pl.BlockSpec((tb, n_cat), lambda i: (i, 0)),                 # offsetted cat ids tile
                pl.BlockSpec((d_num, n_tok * d_tok), lambda i: (0, 0)),      # grid-invariant
                pl.BlockSpec((n_emb, n_tok * d_tok), lambda i: (0, 0)),      # grid-invariant
                pl.BlockSpec((1, n_tok * d_tok), lambda i: (0, 0)),          # grid-invariant
            ],
            out_specs=pl.BlockSpec((tb, n_tok * d_tok), lambda i: (i, 0)),   # lane-dense output
        ),
        compiler_params=pltpu.CompilerParams(
            dimension_semantics=("parallel",)),
    )(x_num, x_cat_idx, w_proj, emb_proj, bias_flat)

    return out_flat.reshape(B, n_tok, d_tok)


def _kaiming_uniform(key, shape, fan_in):
    # matches nn.init.kaiming_uniform_(a=sqrt(5)) bound = 1/sqrt(fan_in)
    bound = 1.0 / math.sqrt(fan_in)
    return jax.random.uniform(key, shape, jnp.float32, -bound, bound)


if __name__ == "__main__":
    # Module config: d_numerical=4, categories=[3,5,7], d_token=32, bias=True
    B = 16                      # 2 grid steps at tb=8 -> both v7x TensorCores busy
    d_numerical = 4
    categories = [3, 5, 7]
    d_token = 32
    n_cat = len(categories)
    n_emb = sum(categories)
    d_bias = d_numerical + n_cat

    key = jax.random.PRNGKey(0)
    kw, ke, kb, kx, *kc = jax.random.split(key, 4 + n_cat)

    weight = _kaiming_uniform(kw, (d_numerical, d_token), d_token)
    emb = _kaiming_uniform(ke, (n_emb, d_token), d_token)
    bias = _kaiming_uniform(kb, (d_bias, d_token), d_token)
    offsets = jnp.cumsum(jnp.array([0] + categories[:-1], dtype=jnp.int32))

    x_num = jax.random.normal(kx, (B, d_numerical), jnp.float32)
    x_cat = jnp.concatenate(
        [jax.random.randint(kc[c], (B, 1), 0, categories[c], jnp.int32)
         for c in range(n_cat)], axis=1)

    out = tokenizer_forward(x_num, x_cat, offsets, weight, emb, bias, categories)
    out = jax.block_until_ready(out)

    # pure-JAX reference for correctness
    ref_num = weight[None] * x_num[:, :, None]                  # (B, d_num, d_tok)
    ref_cat = emb[x_cat + offsets[None]]                        # (B, n_cat, d_tok)
    ref = jnp.concatenate([ref_num, ref_cat], axis=1) + bias[None]
    assert out.shape == (B, d_numerical + n_cat, d_token)
    assert jnp.allclose(out, ref, atol=1e-4, rtol=1e-4), "mismatch vs reference"

    # TODO(synk): categories=None path (numerical-only tokenizer) not exercised here.
    print("KERNEL_OK")
</pallas_src>

<mosaic_0001>
module attributes {stable_mosaic.version = 11 : i64} {
  func.func @tokenizer_kernel(%arg0: i32, %arg1: memref<8x4xf32, #tpu.memory_space<vmem>>, %arg2: memref<8x3xi32, #tpu.memory_space<vmem>>, %arg3: memref<4x224xf32, #tpu.memory_space<vmem>>, %arg4: memref<15x224xf32, #tpu.memory_space<vmem>>, %arg5: memref<1x224xf32, #tpu.memory_space<vmem>>, %arg6: memref<8x224xf32, #tpu.memory_space<vmem>>) attributes {dimension_semantics = [#tpu.dimension_semantics<parallel>], iteration_bounds = array<i64: 2>, scalar_prefetch = 0 : i64, scratch_operands = 0 : i64, tpu.core_type = #tpu.core_type<tc>, window_params = [{transform_indices = @transform_0, window_bounds = array<i64: 8, 4>}, {transform_indices = @transform_1, window_bounds = array<i64: 8, 3>}, {pipeline_mode = #tpu.pipeline_mode<synchronous>, transform_indices = @transform_2, window_bounds = array<i64: 4, 224>}, {pipeline_mode = #tpu.pipeline_mode<synchronous>, transform_indices = @transform_3, window_bounds = array<i64: 15, 224>}, {pipeline_mode = #tpu.pipeline_mode<synchronous>, transform_indices = @transform_4, window_bounds = array<i64: 1, 224>}, {transform_indices = @transform_5, window_bounds = array<i64: 8, 224>}]} {
    %c0 = arith.constant 0 : index
    %c0_0 = arith.constant 0 : index
    %0 = vector.load %arg1[%c0, %c0_0] : memref<8x4xf32, #tpu.memory_space<vmem>>, vector<8x4xf32>
    %c0_1 = arith.constant 0 : index
    %c0_2 = arith.constant 0 : index
    %1 = vector.load %arg3[%c0_1, %c0_2] : memref<4x224xf32, #tpu.memory_space<vmem>>, vector<4x224xf32>
    %cst = arith.constant dense<0.000000e+00> : vector<8x224xf32>
    %2 = tpu.matmul %0, %1, %cst {dimension_numbers = #tpu.dot_dimension_numbers<[1], [0], [0], [1], [0, 0, 1, 1], [], []>} : vector<8x4xf32>, vector<4x224xf32>, vector<8x224xf32> -> vector<8x224xf32>
    %c0_3 = arith.constant 0 : index
    %c0_4 = arith.constant 0 : index
    %3 = vector.load %arg2[%c0_3, %c0_4] : memref<8x3xi32, #tpu.memory_space<vmem>>, vector<8x3xi32>
    %4 = tpu.iota {dimensions = array<i32: 1>} : vector<8x15xi32>
    %5 = vector.extract_strided_slice %3 {offsets = [0, 0], sizes = [8, 1], strides = [1, 1]} : vector<8x3xi32> to vector<8x1xi32>
    %6 = vector.broadcast %5 : vector<8x1xi32> to vector<8x15xi32>
    %7 = arith.cmpi eq, %6, %4 : vector<8x15xi32>
    %8 = arith.extui %7 : vector<8x15xi1> to vector<8x15xi32>
    %9 = arith.sitofp %8 : vector<8x15xi32> to vector<8x15xf32>
    %10 = vector.extract_strided_slice %3 {offsets = [0, 1], sizes = [8, 1], strides = [1, 1]} : vector<8x3xi32> to vector<8x1xi32>
    %11 = vector.broadcast %10 : vector<8x1xi32> to vector<8x15xi32>
    %12 = arith.cmpi eq, %11, %4 : vector<8x15xi32>
    %13 = arith.extui %12 : vector<8x15xi1> to vector<8x15xi32>
    %14 = arith.sitofp %13 : vector<8x15xi32> to vector<8x15xf32>
    %15 = arith.addf %9, %14 : vector<8x15xf32>
    %16 = vector.extract_strided_slice %3 {offsets = [0, 2], sizes = [8, 1], strides = [1, 1]} : vector<8x3xi32> to vector<8x1xi32>
    %17 = vector.broadcast %16 : vector<8x1xi32> to vector<8x15xi32>
    %18 = arith.cmpi eq, %17, %4 : vector<8x15xi32>
    %19 = arith.extui %18 : vector<8x15xi1> to vector<8x15xi32>
    %20 = arith.sitofp %19 : vector<8x15xi32> to vector<8x15xf32>
    %21 = arith.addf %15, %20 : vector<8x15xf32>
    %c0_5 = arith.constant 0 : index
    %c0_6 = arith.constant 0 : index
    %22 = vector.load %arg4[%c0_5, %c0_6] : memref<15x224xf32, #tpu.memory_space<vmem>>, vector<15x224xf32>
    %cst_7 = arith.constant dense<0.000000e+00> : vector<8x224xf32>
    %23 = tpu.matmul %21, %22, %cst_7 {dimension_numbers = #tpu.dot_dimension_numbers<[1], [0], [0], [1], [0, 0, 1, 1], [], []>} : vector<8x15xf32>, vector<15x224xf32>, vector<8x224xf32> -> vector<8x224xf32>
    %24 = arith.addf %2, %23 : vector<8x224xf32>
    %c0_8 = arith.constant 0 : index
    %c0_9 = arith.constant 0 : index
    %25 = vector.load %arg5[%c0_8, %c0_9] : memref<1x224xf32, #tpu.memory_space<vmem>>, vector<1x224xf32>
    %26 = vector.broadcast %25 : vector<1x224xf32> to vector<8x224xf32>
    %27 = arith.addf %24, %26 : vector<8x224xf32>
    %c0_10 = arith.constant 0 : index
    %c0_11 = arith.constant 0 : index
    %28 = vector.load %arg6[%c0_10, %c0_11] : memref<8x224xf32, #tpu.memory_space<vmem>>, vector<8x224xf32>
    tpu.vector_store %arg6[%c0_10, %c0_11], %27 {strides = array<i32>} : memref<8x224xf32, #tpu.memory_space<vmem>>, vector<8x224xf32>,
    return
  }
  func.func @transform_0(%arg0: i32) -> (i32, i32) {
    %c0_i32 = arith.constant 0 : i32
    %c0_i32_0 = arith.constant 0 : i32
    return %arg0, %c0_i32 : i32, i32
  }
  func.func @transform_1(%arg0: i32) -> (i32, i32) {
    %c0_i32 = arith.constant 0 : i32
    %c0_i32_0 = arith.constant 0 : i32
    return %arg0, %c0_i32 : i32, i32
  }
  func.func @transform_2(%arg0: i32) -> (i32, i32) {
    %c0_i32 = arith.constant 0 : i32
    %c0_i32_0 = arith.constant 0 : i32
    %c0_i32_1 = arith.constant 0 : i32
    return %c0_i32, %c0_i32_0 : i32, i32
  }
  func.func @transform_3(%arg0: i32) -> (i32, i32) {
    %c0_i32 = arith.constant 0 : i32
    %c0_i32_0 = arith.constant 0 : i32
    %c0_i32_1 = arith.constant 0 : i32
    return %c0_i32, %c0_i32_0 : i32, i32
  }
  func.func @transform_4(%arg0: i32) -> (i32, i32) {
    %c0_i32 = arith.constant 0 : i32
    %c0_i32_0 = arith.constant 0 : i32
    %c0_i32_1 = arith.constant 0 : i32
    return %c0_i32, %c0_i32_0 : i32, i32
  }
  func.func @transform_5(%arg0: i32) -> (i32, i32) {
    %c0_i32 = arith.constant 0 : i32
    %c0_i32_0 = arith.constant 0 : i32
    return %arg0, %c0_i32 : i32, i32
  }
}

</mosaic_0001>

<bundles_post_ra>
// kernel: tpu_custom_call.1
= control target key start
LH: loop header
LB: loop body
LE: loop exit
PB: predicated region body
PF: predicated region fallthrough
CT: control target
= control target key end

     0   :  { %10 = vsyncpa [#allocation3], 0  ;;  %s808_s0 = inlined_call_operand.vmem [shape: f32[16,4], index: 0, kind: input, shape index: {}]   ;;  %s809_s1 = inlined_call_operand.vmem [shape: s32[16,3], index: 1, kind: input, shape index: {}]   ;;  %s810_s2 = inlined_call_operand.vmem [shape: f32[4,224], index: 2, kind: input, shape index: {}]   ;;  %s811_s3 = inlined_call_operand.vmem [shape: f32[15,224], index: 3, kind: input, shape index: {}]   ;;  %s812_s4 = inlined_call_operand.vmem [shape: f32[1,224], index: 4, kind: input, shape index: {}]   ;;  %s813_s5 = inlined_call_operand.hbm [shape: f32[16,224], index: 5, kind: output, shape index: {}]  }
   0x1   :  { %12 = vsyncpa [#allocation3 + $0x1], 0  ;;  %s700_s18 = smov 0   ;;  %s702_s19 = smov 0  }
   0x2   :  { %s704_s20 = smov 0   ;;  %s706_s21 = smov 0  }
   0x3 LB: > { %s721_s22 = sadd.s32 4294967295, %s663_s21   ;;  %s533_s23 = sadd.s32 4294967294, %s663_s21   ;;  %s663_s21 = sphi %s706_s21, %s819_s21   ;;  %s659_s20 = sphi %s704_s20, %s818_s20   ;;  %s655_s19 = sphi %s702_s19, %s817_s19   ;;  %s651_s18 = sphi %s700_s18, %s816_s18  }
   0x4   : > { %s725_s24 = sadd.s32 1, %s663_s21   ;;  %s140_s25 = sadd.s32 1, %s659_s20 }
   0x5   : > { %s137_s26 = ssub.s32 %s663_s21, %s725_s24  ;;  %p150_p0 = scmp.ne.s32.totalorder %s659_s20, %s655_s19 }
   0x6   : > { %p138_p1 = scmp.eq.s32.totalorder %s137_s26, 0  ;;  %p151_p2 = scmp.eq.s32.totalorder %s721_s22, 1 }
   0x7   : > { %p156_p3 = scmp.ne.s32.totalorder %s655_s19, %s651_s18  ;;  %p157_p4 = scmp.eq.s32.totalorder %s533_s23, 1 }
   0x8   : > { %s736_s27 = scalar_select %p138_p1, %s659_s20, %s140_s25  }
   0x9   : > { %p738_p5 = por %p151_p2, %p150_p0  ;;  %p742_p6 = por %p157_p4, %p156_p3 }
   0xa   : > { %p536_p7 = scmp.ge.s32.totalorder %s663_s21, 1  ;;  %p198_p8 = scmp.lt.s32.totalorder %s663_s21, 3 }
   0xc   : > { %p199_p9 = pnand %p536_p7, %p198_p8 }
   0xd   : > { %p229_p10 = scmp.lt.s32.totalorder (!%p199_p9), %s721_s22, 1  ;;  %s554_s11 = sshll.u32 (!%p199_p9), %s721_s22, 8 }
   0xe   : > { %202 = sbr.rel (%p199_p9) target bundleno = 371 (0x173), region = 40  ;;  %s460_s16 = scalar_lea.hbm (!%p199_p9), %s813_s5, %s554_s11 }
  0x13   : > { %v665_v0 = vmov 0   ;;  %v666_v1 = vmov 2   ;;  %s230_s30 = scalar_select %p229_p10, %s721_s22, 1  ;;  %v667_v2 = vmov 0.0   ;;  %v238_v4 = vld [vmem:[%s810_s2] sm:$0xff]  ;;  %vm270_vm0 = vcmask 1046528  }
  0x14   : > { %598 = vset.pattern.permute.xlu0 %v665_v0  ;;  %600 = vset.pattern.permute.xlu1 %v666_v1  ;;  %v349_v5 = vcombine.high %v238_v4, %v238_v4  ;;  %v265_v6 = vld [vmem:[%s811_s3 + $0x18] sm:$0x7f]  ;;  %vm354_vm1 = vcmask 1043456   ;;  %v264_v7 = vld [vmem:[%s811_s3 + $0x10] sm:$0x7f]  ;;  %v668_v8 = vmov 1   ;;  %v240_v12 = vlaneseq }
  0x15   : > { %423 = vmatprep.mubr.f32.mxu1 %v667_v2  ;;  %341 = vmatprep.mubr.f32.mxu0 %v667_v2  ;;  %s538_s6 = sshll.u32 %s230_s30, 3  ;;  %v263_v9 = vld [vmem:[%s811_s3 + $0x8] sm:$0xff]  ;;  %vm350_vm2 = vcmask 31744   ;;  %v262_v11 = vld [vmem:[%s811_s3] sm:$0xff]  ;;  %vm266_vm6 = vcmask 121856   ;;  %vm445_vm7 = vcmask 785408  }
  0x16   : > { %s236_s9 = scalar_lea.vmem %s809_s1, %s538_s6  ;;  %543 = vmatprep.subr.msk.mxu0 %vm270_vm0, %v265_v6  ;;  %546 = vmatprep.subr.msk.mxu1 %vm354_vm1, %v349_v5  ;;  %s232_s23 = scalar_lea.vmem %s808_s0, %s538_s6  ;;  %v241_v13 = vand.u32 127, %v240_v12  ;;  %v433_v22 = vshrl.u32 %v240_v12, 7  ;;  %v430_v24 = vld [vmem:[%s812_s4] sm:$0x3] }
  0x17   : > { %v239_v3 = vld [vmem:[%s236_s9] sm:$0xff]  ;;  %544 = vmatpush1.msk.msra.mxu0 %vm270_vm0, %v264_v7  ;;  %547 = vmatpush1.msk.msra.mxu1 %vm354_vm1, %v238_v4  ;;  %s226_s6 = sand.u32 1, %s655_s19   ;;  %s669_s22 = smov [#allocation2]  }
  0x18   : > { %243 = vperm.xlu0 %598, %v239_v3   ;;  %256 = vperm.xlu1 %600, %v239_v3   ;;  %v237_v10 = vld [vmem:[%s232_s23] sm:$0xff]  ;;  %v434_v23 = vsub.s32 0, %v433_v22  ;;  %s537_s8 = sshll.u32 %s226_s6, 4  ;;  %v438_v25 = vsub.s32 1, %v433_v22  ;;  %s448_s17 = scalar_lea.sflag [#allocation3], %s226_s6 }
  0x19   : > { %307 = vmatprep.subr.mxu0 %v263_v9  ;;  %548 = vmatmul.mubr.msk.f32.vlgmr.msra.gmra.mxu1 %vm350_vm2, %v237_v10  ;;  %s228_s12 = scalar_lea.vmem [#allocation2], %s537_s8  ;;  %s607_s25 = sshll.u32 %s669_s22, 4  ;;  %s608_s25 = int_to_ptr.vmem [resolvable:$false] %s607_s25 }
  0x1a   : > { %308 = vmatpush1.msra.mxu0 %v262_v11  ;;  %v435_v27 = vrot.slane %v430_v24, %v434_v23  ;;  %v439_v30 = vrot.slane %v430_v24, %v438_v25  ;;  %s462_s13 = sshll.u32 %s228_s12, 4  ;;  %s609_s26 = scalar_lea.vmem %s608_s25, 512  ;;  %s463_s13 = int_to_ptr.vmem [resolvable:$true] %s462_s13 }
  0x1b   : > { %s603_s23 = scalar_lea.vmem %s463_s13, 256  ;;  %p610_p0 = scmp.lt.s32.totalorder %s463_s13, %s608_s25 }
  0x1c   : > { %599 = vset.pattern.permute.xlu0 %v668_v8  ;;  %p604_p11 = scmp.ne.s32.totalorder %s463_s13, %s603_s23  ;;  %p611_p1 = scmp.lt.s32.totalorder %s609_s26, %s603_s23 }
  0x1d   : > { %249 = vperm.xlu0 %599, %v239_v3  }
  0x1e   : > { %p605_p12 = pnand %p604_p11, %p738_p5  ;;  %p612_p2 = por %p611_p1, %p610_p0 }
  0x20   : > { %p606_p13 = pneg %p605_p12 }
  0x21   : > { %601 = vset.pattern.permute.xlu0 %v666_v1 }
  0x22   : > { %p613_p3 = pnand %p612_p2, %p606_p13 }
  0x93   : > { %v244_v14 = vpop.permute.xlu0 %243  ;;  %v257_v15 = vpop.permute.xlu1 %256 }
  0x94   : > { %vm245_vm3 = vcmp.eq.s32.totalorder %v244_v14, %v241_v13  ;;  %vm258_vm4 = vcmp.eq.s32.totalorder %v257_v15, %v241_v13 }
  0x95   : > { %v540_v17 = vsel %vm245_vm3, 1.0, %v667_v2  ;;  %v542_v19 = vsel %vm258_vm4, 1.0, %v667_v2 }
  0x98   : > { %v250_v16 = vpop.permute.xlu0 %249 }
  0x99   : > { %vm251_vm5 = vcmp.eq.s32.totalorder %v250_v16, %v241_v13 }
  0x9a   : > { %v541_v18 = vsel %vm251_vm5, 1.0, %v667_v2 }
  0x9b   : > { %v254_v20 = vadd.f32 %v541_v18, %v540_v17 }
  0x9d   : > { %v261_v21 = vadd.f32 %v542_v19, %v254_v20 }
  0x9f   : > { %545 = vmatmul.mubr.msk.f32.vlgmr.msra.gmra.mxu0 %vm266_vm6, %v261_v21 }
  0xd9   : > { %v425_v26 = vpop.f32.mrf.mxu1 }
  0xdb   : > { %v427_v31 = vpop.f32.mrf.mxu1 }
 0x15f   : > { %v343_v28 = vpop.f32.mrf.mxu0 }
 0x160   : > { %v426_v29 = vadd.f32 %v425_v26, %v343_v28 }
 0x161   : > { %v345_v32 = vpop.f32.mrf.mxu0 }
 0x162   : > { %v442_v33 = vadd.f32 %v435_v27, %v426_v29  ;;  %v428_v34 = vadd.f32 %v427_v31, %v345_v32 }
 0x164   : > { %444 = vst [vmem:[%s228_s12] sm:$0xff] %v442_v33  ;;  %v443_v35 = vadd.f32 %v439_v30, %v428_v34 }
 0x166   : > { %446 = vst.msk [vmem:[%s228_s12 + $0x8] sm:$0xff] %vm445_vm7, %v443_v35 }
 0x167   : > { %616 = shalt.err (!%p613_p3)
}
 0x168   : > { %s617_s30 = scalar_lea.hbm %s460_s16, 256  ;;  %s621_s8 = scalar_lea.hbm %s813_s5, 512 }
 0x169   : > { %p618_p4 = scmp.ne.s32.totalorder %s460_s16, %s617_s30  ;;  %p622_p9 = scmp.lt.s32.totalorder %s460_s16, %s813_s5 }
 0x16a   : > { %p623_p10 = scmp.lt.s32.totalorder %s621_s8, %s617_s30 }
 0x16b   : > { %p619_p7 = pnand %p618_p4, %p738_p5 }
 0x16c   : > { %p624_p11 = por %p623_p10, %p622_p9 }
 0x16d   : > { %p620_p8 = pneg %p619_p7 }
 0x16f   : > { %p625_p12 = pnand %p624_p11, %p620_p8 }
 0x171   : > { %628 = shalt.err (!%p625_p12)
}
 0x172   : > { %555 = dma.vmem_to_hbm [thread:$0]  (%p738_p5), %s463_s13, 256, %s460_s16, %s448_s17  }
 0x173 PF: > { %p561_p13 = scmp.ge.s32.totalorder %s663_s21, 2  ;;  %s474_s11 = sand.u32 1, %s651_s18  }
 0x174   : > { %s475_s12 = scalar_lea.sflag [#allocation3], %s474_s11 }
 0x175   : > { %p558_p0 = pnand %p561_p13, %p742_p6 }
 0x177   : > { %p559_p1 = pneg %p558_p0 }
 0x179   : > { %646 = dma.done.wait (%p559_p1), %s475_s12, 256  }
 0x17a   : > { %648 = vsyncadd (%p559_p1), %s475_s12, 4294967040  ;;  %p15_p2 = scmp.ge.s32.totalorder %s725_s24, 4   ;;  %s816_s18 = smov %s655_s19 }
 0x17b   : > { %s817_s19 = smov %s659_s20  ;;  %s818_s20 = smov %s736_s27 }
 0x17c   : > { %s819_s21 = smov %s725_s24  ;;  %17 = sbr.rel (!%p15_p2) target bundleno = 3 (0x3), region = 78 }
 0x181   :  { %480 = vsyncpa [#allocation3], 1 }
 0x182   :  { %482 = vsyncpa [#allocation3 + $0x1], 1 }

</bundles_post_ra>
